<compile_context>
chip_gen: v7x
topology: tpu7x:2x2x1
jax: 0.10.0
libtpu: 0.0.40
codegen_flags: <defaults>
</compile_context>

<pallas_src>
import jax
import jax.numpy as jnp
from jax.experimental import pallas as pl
from jax.experimental.pallas import tpu as pltpu


def _passthrough_kernel(out_in_ref, ker_in_ref, out_o_ref, ker_o_ref):
    # Pure pass-through: load each full VMEM tile and store it unchanged.
    out_o_ref[...] = out_in_ref[...]
    ker_o_ref[...] = ker_in_ref[...]


def channel_out_kernel_forward(params_out, params_kernel):
    """Forward pass of ChannelOutKernel.

    Args:
      params_out:    jnp.ndarray of shape (1, c_out, 1, 1, 1).
      params_kernel: jnp.ndarray of shape (1, 1, 1, 3, 3).

    Returns:
      dict {'out': ..., 'kernel': ...} identical (shape/dtype/values) to the
      parameters, produced through a single grid-less Pallas TPU kernel.
    """
    c_out = params_out.shape[1]
    k_elems = params_kernel.shape[-2] * params_kernel.shape[-1]  # 3*3 = 9

    # Lane-major 2-D slabs for the kernel (channels / taps on the lane axis).
    out_2d = params_out.reshape(1, c_out)
    ker_2d = params_kernel.reshape(1, k_elems)

    out_flat, ker_flat = pl.pallas_call(
        _passthrough_kernel,
        out_shape=(
            jax.ShapeDtypeStruct(out_2d.shape, out_2d.dtype),
            jax.ShapeDtypeStruct(ker_2d.shape, ker_2d.dtype),
        ),
        # Full-array blocks: no block_shape, no index_map, no grid.
        in_specs=[
            pl.BlockSpec(memory_space=pltpu.VMEM),
            pl.BlockSpec(memory_space=pltpu.VMEM),
        ],
        out_specs=(
            pl.BlockSpec(memory_space=pltpu.VMEM),
            pl.BlockSpec(memory_space=pltpu.VMEM),
        ),
        # Alias output buffers onto the input buffers: the "copy" becomes an
        # effective no-op pass-through (no new HBM allocation / writeback).
        input_output_aliases={0: 0, 1: 1},
    )(out_2d, ker_2d)

    return {
        "out": out_flat.reshape(params_out.shape),
        "kernel": ker_flat.reshape(params_kernel.shape),
    }


def init_channel_out_kernel(conv_dimension, dtype=jnp.float32):
    """Deterministic parameter init matching the PyTorch __init__ (zeros)."""
    _c_in, c_out = conv_dimension
    params_out = jnp.zeros((1, c_out, 1, 1, 1), dtype=dtype)
    params_kernel = jnp.zeros((1, 1, 1, 3, 3), dtype=dtype)
    return params_out, params_kernel


if __name__ == "__main__":
    conv_dimension = (4, 4)
    _c_in, c_out = conv_dimension

    # Deterministic "example inputs": the parameters themselves.  PyTorch
    # initializes them to zeros; here we use PRNGKey(0) random values so the
    # pass-through is actually exercised (not trivially zero == zero).
    key = jax.random.PRNGKey(0)
    k1, k2 = jax.random.split(key)
    params_out = jax.random.normal(k1, (1, c_out, 1, 1, 1), dtype=jnp.float32)
    params_kernel = jax.random.normal(k2, (1, 1, 1, 3, 3), dtype=jnp.float32)

    result = channel_out_kernel_forward(params_out, params_kernel)
    jax.block_until_ready(result)

    # Sanity checks against the reference semantics.
    assert result["out"].shape == (1, c_out, 1, 1, 1)
    assert result["kernel"].shape == (1, 1, 1, 3, 3)
    assert result["out"].dtype == params_out.dtype
    assert result["kernel"].dtype == params_kernel.dtype
    assert bool(jnp.all(result["out"] == params_out))
    assert bool(jnp.all(result["kernel"] == params_kernel))

    # Also exercise the PyTorch-matching zeros init path.
    z_out, z_ker = init_channel_out_kernel(conv_dimension)
    z_res = channel_out_kernel_forward(z_out, z_ker)
    jax.block_until_ready(z_res)
    assert bool(jnp.all(z_res["out"] == 0.0))
    assert bool(jnp.all(z_res["kernel"] == 0.0))

    print("KERNEL_OK")
</pallas_src>

<mosaic_0001>
module attributes {stable_mosaic.version = 11 : i64} {
  func.func @_passthrough_kernel(%arg0: memref<1x4xf32, #tpu.memory_space<vmem>>, %arg1: memref<1x9xf32, #tpu.memory_space<vmem>>, %arg2: memref<1x4xf32, #tpu.memory_space<vmem>>, %arg3: memref<1x9xf32, #tpu.memory_space<vmem>>) attributes {dimension_semantics = [], scalar_prefetch = 0 : i64, scratch_operands = 0 : i64, tpu.core_type = #tpu.core_type<tc>} {
    %c0 = arith.constant 0 : index
    %c0_0 = arith.constant 0 : index
    %0 = vector.load %arg0[%c0, %c0_0] : memref<1x4xf32, #tpu.memory_space<vmem>>, vector<1x4xf32>
    %c0_1 = arith.constant 0 : index
    %c0_2 = arith.constant 0 : index
    %1 = vector.load %arg2[%c0_1, %c0_2] : memref<1x4xf32, #tpu.memory_space<vmem>>, vector<1x4xf32>
    tpu.vector_store %arg2[%c0_1, %c0_2], %0 {strides = array<i32>} : memref<1x4xf32, #tpu.memory_space<vmem>>, vector<1x4xf32>,
    %c0_3 = arith.constant 0 : index
    %c0_4 = arith.constant 0 : index
    %2 = vector.load %arg1[%c0_3, %c0_4] : memref<1x9xf32, #tpu.memory_space<vmem>>, vector<1x9xf32>
    %c0_5 = arith.constant 0 : index
    %c0_6 = arith.constant 0 : index
    %3 = vector.load %arg3[%c0_5, %c0_6] : memref<1x9xf32, #tpu.memory_space<vmem>>, vector<1x9xf32>
    tpu.vector_store %arg3[%c0_5, %c0_6], %2 {strides = array<i32>} : memref<1x9xf32, #tpu.memory_space<vmem>>, vector<1x9xf32>,
    return
  }
}

</mosaic_0001>

<bundles_post_ra>
// kernel: tpu_custom_call.1
= control target key start
LH: loop header
LB: loop body
LE: loop exit
PB: predicated region body
PF: predicated region fallthrough
CT: control target
= control target key end

     0   :  { %9 = vsyncpa [#allocation3], 0  ;;  %s255_s0 = inlined_call_operand.hbm [shape: f32[1,4], index: 0, kind: input, shape index: {}, may-alias: {0,2}]   ;;  %s256_s1 = inlined_call_operand.hbm [shape: f32[1,9], index: 1, kind: input, shape index: {}, may-alias: {1,3}]   ;;  %s257_s2 = inlined_call_operand.hbm [shape: f32[1,4], index: 2, kind: output, shape index: {0}, may-alias: {0,2}]   ;;  %s258_s3 = inlined_call_operand.hbm [shape: f32[1,9], index: 3, kind: output, shape index: {1}, may-alias: {1,3}]  }
   0x1   :  { %10 = vsyncpa [#allocation6], 0 }
   0x2   :  { %11 = vsyncpa [#allocation4], 0 }
   0x3   :  { %12 = vsyncpa [#allocation9], 0  ;;  %s175_s12 = smov [#allocation2]   ;;  %s176_s14 = smov [#allocation5]  }
   0x4   :  { %s19_s13 = sshll.u32 %s175_s12, 4  ;;  %s29_s15 = sshll.u32 %s176_s14, 4  ;;  %s20_s13 = int_to_ptr.vmem [resolvable:$true] %s19_s13  ;;  %s30_s15 = int_to_ptr.vmem [resolvable:$true] %s29_s15 }
   0x5   :  { %s79_s18 = scalar_lea.hbm %s255_s0, 16 }
   0x6   :  { %p80_p0 = scmp.ne.s32.totalorder %s255_s0, %s79_s18  ;;  %p83_p1 = scmp.lt.u32.totalorder %s79_s18, %s255_s0 }
   0x8   :  { %p85_p2 = pnand %p83_p1, %p80_p0 }
   0xa   :  { %88 = shalt.err (!%p85_p2)
}
   0xb   :  { %s89_s23 = scalar_lea.vmem %s20_s13, 16  ;;  %s93_s24 = scalar_lea.vmem %s20_s13, 32 }
   0xc   :  { %p90_p3 = scmp.ne.s32.totalorder %s20_s13, %s89_s23  ;;  %p94_p4 = scmp.lt.s32.totalorder %s20_s13, %s20_s13 }
   0xd   :  { %p95_p5 = scmp.lt.s32.totalorder %s93_s24, %s89_s23 }
   0xf   :  { %p96_p6 = por %p95_p5, %p94_p4 }
  0x11   :  { %p97_p7 = pnand %p96_p6, %p90_p3 }
  0x13   :  { %100 = shalt.err (!%p97_p7)
}
  0x14   :  { %22 = dma.hbm_to_vmem [thread:$0]  %s255_s0, 16, %s20_s13, [#allocation3]  }
  0x15   :  { %s101_s29 = scalar_lea.hbm %s256_s1, 16 }
  0x16   :  { %p102_p8 = scmp.ne.s32.totalorder %s256_s1, %s101_s29  ;;  %p105_p9 = scmp.lt.u32.totalorder %s101_s29, %s256_s1 }
  0x18   :  { %p107_p10 = pnand %p105_p9, %p102_p8 }
  0x1a   :  { %110 = shalt.err (!%p107_p10)
}
  0x1b   :  { %s111_s7 = scalar_lea.vmem %s30_s15, 16  ;;  %s115_s8 = scalar_lea.vmem %s30_s15, 32 }
  0x1c   :  { %p112_p11 = scmp.ne.s32.totalorder %s30_s15, %s111_s7  ;;  %p116_p12 = scmp.lt.s32.totalorder %s30_s15, %s30_s15 }
  0x1d   :  { %p117_p13 = scmp.lt.s32.totalorder %s115_s8, %s111_s7 }
  0x1f   :  { %p118_p0 = por %p117_p13, %p116_p12 }
  0x21   :  { %p119_p1 = pnand %p118_p0, %p112_p11 }
  0x23   :  { %122 = shalt.err (!%p119_p1)
}
  0x24   :  { %32 = dma.hbm_to_vmem [thread:$0]  %s256_s1, 16, %s30_s15, [#allocation6]  }
  0x25   :  { %167 = dma.done.wait [#allocation3], 16  }
  0x26   :  { %168 = vsyncadd [#allocation3], 4294967280 }
  0x27   :  { %169 = dma.done.wait [#allocation6], 16  }
  0x28   :  { %170 = vsyncadd [#allocation6], 4294967280  ;;  %s177_s10 = smov [#allocation7]   ;;  %s178_s12 = smov [#allocation8]   ;;  %vm40_vm0 = vcmask 24576   ;;  %vm43_vm1 = vcmask 65536  }
  0x29   :  { %s51_s11 = sshll.u32 %s177_s10, 4  ;;  %s61_s13 = sshll.u32 %s178_s12, 4  ;;  %v39_v0 = vld [vmem:[#allocation2] sm:$0x1]  ;;  %v42_v1 = vld [vmem:[#allocation5] sm:$0x1]  ;;  %s52_s11 = int_to_ptr.vmem [resolvable:$true] %s51_s11  ;;  %s223_s13 = int_to_ptr.vmem [resolvable:$true] %s61_s13 }
  0x2a   :  { %41 = vst.msk [vmem:[#allocation7] sm:$0x1] %vm40_vm0, %v39_v0  ;;  %s123_s14 = scalar_lea.vmem %s52_s11, 16  ;;  %s127_s1 = scalar_lea.vmem %s52_s11, 32 }
  0x2b   :  { %44 = vst.msk [vmem:[#allocation8] sm:$0x1] %vm43_vm1, %v42_v1  ;;  %p124_p2 = scmp.ne.s32.totalorder %s52_s11, %s123_s14  ;;  %p128_p3 = scmp.lt.s32.totalorder %s52_s11, %s52_s11 }
  0x2c   :  { %p129_p4 = scmp.lt.s32.totalorder %s127_s1, %s123_s14 }
  0x2e   :  { %p130_p5 = por %p129_p4, %p128_p3 }
  0x30   :  { %p131_p6 = pnand %p130_p5, %p124_p2 }
  0x32   :  { %134 = shalt.err (!%p131_p6)
}
  0x33   :  { %s135_s17 = scalar_lea.hbm %s257_s2, 16 }
  0x34   :  { %p136_p7 = scmp.ne.s32.totalorder %s257_s2, %s135_s17  ;;  %p139_p8 = scmp.lt.u32.totalorder %s135_s17, %s257_s2 }
  0x36   :  { %p141_p9 = pnand %p139_p8, %p136_p7 }
  0x38   :  { %144 = shalt.err (!%p141_p9)
}
  0x39   :  { %54 = dma.vmem_to_hbm [thread:$0]  %s52_s11, 16, %s257_s2, [#allocation4]  }
  0x3a   :  { %s145_s24 = scalar_lea.vmem %s223_s13, 16  ;;  %s149_s25 = scalar_lea.vmem %s223_s13, 32 }
  0x3b   :  { %p146_p10 = scmp.ne.s32.totalorder %s223_s13, %s145_s24  ;;  %p150_p11 = scmp.lt.s32.totalorder %s223_s13, %s223_s13 }
  0x3c   :  { %p151_p12 = scmp.lt.s32.totalorder %s149_s25, %s145_s24 }
  0x3e   :  { %p152_p13 = por %p151_p12, %p150_p11 }
  0x40   :  { %p153_p0 = pnand %p152_p13, %p146_p10 }
  0x42   :  { %156 = shalt.err (!%p153_p0)
}
  0x43   :  { %s157_s28 = scalar_lea.hbm %s258_s3, 16 }
  0x44   :  { %p158_p1 = scmp.ne.s32.totalorder %s258_s3, %s157_s28  ;;  %p161_p2 = scmp.lt.u32.totalorder %s157_s28, %s258_s3 }
  0x46   :  { %p163_p3 = pnand %p161_p2, %p158_p1 }
  0x48   :  { %166 = shalt.err (!%p163_p3)
}
  0x49   :  { %64 = dma.vmem_to_hbm [thread:$0]  %s223_s13, 16, %s258_s3, [#allocation9]  }
  0x4a   :  { %171 = dma.done.wait [#allocation4], 16  }
  0x4b   :  { %172 = vsyncadd [#allocation4], 4294967280 }
  0x4c   :  { %173 = dma.done.wait [#allocation9], 16  }
  0x4d   :  { %174 = vsyncadd [#allocation9], 4294967280 }
  0x4e   :  { %71 = vsyncpa [#allocation3], 1 }
  0x4f   :  { %72 = vsyncpa [#allocation6], 1 }
  0x50   :  { %73 = vsyncpa [#allocation4], 1 }
  0x51   :  { %74 = vsyncpa [#allocation9], 1 }

</bundles_post_ra>
